<compile_context>
chip_gen: v5e
topology: v5e:2x2
jax: 0.10.0
libtpu: 0.0.40
codegen_flags: <defaults>
</compile_context>

<pallas_src>
import functools

import jax
import jax.numpy as jnp
from jax import lax
from jax.experimental import pallas as pl
from jax.experimental.pallas import tpu as pltpu


def _blur_kernel(W, masks_ref, x_ref, o_ref, xp_ref, vp_ref):
    """Depthwise 3x3 binomial blur on B independent slabs flattened to (B, H*W).

    masks_ref: VMEM (2, HW) f32   row 0: 1.0 where w > 0    (left tap valid)
                                  row 1: 1.0 where w < W-1  (right tap valid)
    x_ref    : VMEM (B, HW)       input slabs, one image per row
    o_ref    : VMEM (B, HW)       output slabs
    xp_ref   : VMEM (B, HW+2W) f32  input with a W-wide zero halo at both ends
    vp_ref   : VMEM (B, HW+2)  f32  vertical-pass result with a 1-wide halo
    """
    B, HW = o_ref.shape
    f32 = jnp.float32

    # Stage the input with W zeros on each end of the flattened axis: a lane
    # shift of +-W (one image row) then lands in zeros for h = 0 / h = H-1,
    # i.e. the conv's vertical zero padding.  Only the halo strips are
    # (re)zeroed -- never the full scratch.  Re-zeroed every grid step:
    # cheap, and safe under megacore sharding (program_id 0 may never run on
    # a given core, so a one-time init would be wrong).
    xp_ref[:, pl.ds(0, W)] = jnp.zeros((B, W), f32)
    xp_ref[:, pl.ds(W + HW, W)] = jnp.zeros((B, W), f32)
    xp_ref[:, pl.ds(W, HW)] = x_ref[...].astype(f32)

    # Vertical [1, 2, 1] pass: taps at flattened offsets -W, 0, +W.
    v = (xp_ref[:, pl.ds(0, HW)]
         + 2.0 * xp_ref[:, pl.ds(W, HW)]
         + xp_ref[:, pl.ds(2 * W, HW)])

    # Stage v with one zero on each end for the +-1 horizontal taps.
    vp_ref[:, pl.ds(0, 1)] = jnp.zeros((B, 1), f32)
    vp_ref[:, pl.ds(HW + 1, 1)] = jnp.zeros((B, 1), f32)
    vp_ref[:, pl.ds(1, HW)] = v

    # Horizontal [1, 2, 1] pass.  A +-1 shift in flattened coordinates crosses
    # an image-row boundary at w == 0 / w == W-1; those terms are zeroed by
    # the precomputed per-column masks (the conv's horizontal zero padding).
    left = masks_ref[pl.ds(0, 1), :]     # (1, HW), broadcast over B rows
    right = masks_ref[pl.ds(1, 1), :]
    out = (left * vp_ref[:, pl.ds(0, HW)]
           + 2.0 * vp_ref[:, pl.ds(1, HW)]
           + right * vp_ref[:, pl.ds(2, HW)])
    o_ref[...] = (out * (1.0 / 16.0)).astype(o_ref.dtype)


def _vmem_capacity_bytes():
    """Per-core VMEM capacity; conservative fallback if the query fails."""
    try:
        cap = getattr(pltpu.get_tpu_info(), "vmem_capacity_bytes", None)
        if cap:
            return int(cap)
    except Exception:
        pass
    return 64 << 20  # v7x per-TensorCore VMEM: safe everywhere


def _pick_block_rows(M, HW, W, in_itemsize, out_itemsize, budget_bytes):
    """How many (n, c) slabs per grid step, from an explicit VMEM budget."""
    per_row = (2 * HW * in_itemsize       # input block (double-buffered)
               + 2 * HW * out_itemsize    # output block (double-buffered)
               + (HW + 2 * W) * 4         # xp halo scratch (f32)
               + (HW + 2) * 4             # vp halo scratch (f32)
               + 3 * HW * 4)              # live f32 intermediates (upcast, v, out)
    b = max(1, budget_bytes // per_row)
    if b >= M:
        if M > 16:
            # Keep >= 2 grid steps so the pipeline has something to overlap
            # and both v7x TensorCores get work.
            return min(M, ((M + 1) // 2 + 7) // 8 * 8)
        return M                           # one block == full dim (always legal)
    return max(8, (b // 8) * 8)            # multiple of 8 for sublane tiling


def blur(x, weight=None, weight_flip=None):
    """Pallas equivalent of Blur.forward: F.conv2d(x, weight, padding=1, groups=C).

    The Blur module's weight is the fixed binomial kernel
    [[1,2,1],[2,4,2],[1,2,1]]/16 repeated per channel; those constants are
    baked into the kernel.  `weight` / `weight_flip` are accepted only for
    API parity with the PyTorch module and are not read.
    # TODO(synk): support arbitrary per-channel 3x3 weights if ever needed.

    x: (N, C, H, W) -> (N, C, H, W)
    """
    N, C, H, W = x.shape
    M = N * C
    HW = H * W

    # Depthwise conv == the same independent 2D stencil per (n, c) slab, so
    # flatten (N, C) -> M and (H, W) -> H*W.  Both reshapes are free
    # (row-major preserving); the lane axis becomes H*W (lane-dense).
    xr = x.reshape(M, HW)

    # Per-column horizontal-boundary masks (depend only on lane position).
    col = jnp.arange(HW, dtype=jnp.int32) % W
    masks = jnp.stack([
        (col > 0).astype(jnp.float32),       # left tap valid
        (col < W - 1).astype(jnp.float32),   # right tap valid
    ])                                       # (2, HW)

    vmem_cap = max(64 << 20, min(_vmem_capacity_bytes(), 128 << 20))
    block_budget = vmem_cap // 2             # v5e/v6e: 64 MiB, v7x: 32 MiB
    vmem_limit = (vmem_cap * 3) // 4         # v5e/v6e: 96 MiB, v7x: 48 MiB

    itemsize = jnp.dtype(x.dtype).itemsize
    B = _pick_block_rows(M, HW, W, itemsize, itemsize, block_budget)
    grid = (pl.cdiv(M, B),)

    out = pl.pallas_call(
        functools.partial(_blur_kernel, W),
        out_shape=jax.ShapeDtypeStruct((M, HW), x.dtype),
        grid=grid,
        in_specs=[
            pl.BlockSpec((2, HW), lambda i: (0, 0)),   # masks: same block each step
            pl.BlockSpec((B, HW), lambda i: (i, 0)),   # input slabs
        ],
        out_specs=pl.BlockSpec((B, HW), lambda i: (i, 0)),
        scratch_shapes=[
            pltpu.VMEM((B, HW + 2 * W), jnp.float32),  # vertical-halo input
            pltpu.VMEM((B, HW + 2), jnp.float32),      # horizontal-halo v
        ],
        compiler_params=pltpu.CompilerParams(
            # Plain "parallel" lets the runtime shard the grid across
            # TensorCores where the chip has more than one (v7x); it is
            # measured near-neutral on single-TC v5e/v6e.
            dimension_semantics=("parallel",),
            vmem_limit_bytes=int(vmem_limit),
        ),
    )(masks, xr)
    return out.reshape(N, C, H, W)


def make_blur_weights(channel):
    # Mirrors Blur.__init__ exactly (deterministic, no checkpoint load).
    w = jnp.array([[1.0, 2.0, 1.0],
                   [2.0, 4.0, 2.0],
                   [1.0, 2.0, 1.0]], dtype=jnp.float32)
    w = w / jnp.sum(w)                                           # /16
    weight = jnp.tile(w[None, None], (channel, 1, 1, 1))         # (C,1,3,3)
    weight_flip = jnp.tile(w[::-1, ::-1][None, None], (channel, 1, 1, 1))
    return weight, weight_flip


def _reference_blur(x, weight):
    # Reference: grouped conv via XLA, identical semantics to
    # F.conv2d(..., padding=1, groups=C).
    C = x.shape[1]
    return lax.conv_general_dilated(
        x, weight,
        window_strides=(1, 1),
        padding=((1, 1), (1, 1)),
        dimension_numbers=("NCHW", "OIHW", "NCHW"),
        feature_group_count=C,
    )


if __name__ == "__main__":
    N, C, H, W = 2, 4, 16, 16
    key = jax.random.PRNGKey(0)
    x = jax.random.normal(key, (N, C, H, W), dtype=jnp.float32)

    weight, weight_flip = make_blur_weights(C)   # weight_flip only used in backward

    out = blur(x, weight, weight_flip)
    out = jax.block_until_ready(out)

    ref = _reference_blur(x, weight)
    assert out.shape == (N, C, H, W)
    assert jnp.allclose(out, ref, atol=1e-5, rtol=1e-5), "mismatch vs conv reference"

    print("KERNEL_OK")
</pallas_src>

<mosaic_0001>
module attributes {stable_mosaic.version = 11 : i64} {
  func.func @_blur_kernel(%arg0: i32, %arg1: memref<2x256xf32, #tpu.memory_space<vmem>>, %arg2: memref<8x256xf32, #tpu.memory_space<vmem>>, %arg3: memref<8x256xf32, #tpu.memory_space<vmem>>, %arg4: memref<8x288xf32, #tpu.memory_space<vmem>>, %arg5: memref<8x258xf32, #tpu.memory_space<vmem>>) attributes {dimension_semantics = [#tpu.dimension_semantics<parallel>], iteration_bounds = array<i64: 1>, scalar_prefetch = 0 : i64, scratch_operands = 2 : i64, tpu.core_type = #tpu.core_type<tc>, window_params = [{pipeline_mode = #tpu.pipeline_mode<synchronous>, transform_indices = @transform_0, window_bounds = array<i64: 2, 256>}, {transform_indices = @transform_1, window_bounds = array<i64: 8, 256>}, {transform_indices = @transform_2, window_bounds = array<i64: 8, 256>}]} {
    %cst = arith.constant 0.000000e+00 : f32
    %0 = vector.broadcast %cst : f32 to vector<8x16xf32>
    %c0 = arith.constant 0 : index
    %c0_0 = arith.constant 0 : index
    %1 = vector.load %arg4[%c0, %c0_0] : memref<8x288xf32, #tpu.memory_space<vmem>>, vector<8x16xf32>
    tpu.vector_store %arg4[%c0, %c0_0], %0 {strides = array<i32>} : memref<8x288xf32, #tpu.memory_space<vmem>>, vector<8x16xf32>,
    %cst_1 = arith.constant 0.000000e+00 : f32
    %2 = vector.broadcast %cst_1 : f32 to vector<8x16xf32>
    %c0_2 = arith.constant 0 : index
    %c272 = arith.constant 272 : index
    %3 = vector.load %arg4[%c0_2, %c272] : memref<8x288xf32, #tpu.memory_space<vmem>>, vector<8x16xf32>
    tpu.vector_store %arg4[%c0_2, %c272], %2 {strides = array<i32>} : memref<8x288xf32, #tpu.memory_space<vmem>>, vector<8x16xf32>,
    %c0_3 = arith.constant 0 : index
    %c0_4 = arith.constant 0 : index
    %4 = vector.load %arg2[%c0_3, %c0_4] : memref<8x256xf32, #tpu.memory_space<vmem>>, vector<8x256xf32>
    %c0_5 = arith.constant 0 : index
    %c16 = arith.constant 16 : index
    %5 = vector.load %arg4[%c0_5, %c16] : memref<8x288xf32, #tpu.memory_space<vmem>>, vector<8x256xf32>
    tpu.vector_store %arg4[%c0_5, %c16], %4 {strides = array<i32>} : memref<8x288xf32, #tpu.memory_space<vmem>>, vector<8x256xf32>,
    %c0_6 = arith.constant 0 : index
    %c0_7 = arith.constant 0 : index
    %6 = vector.load %arg4[%c0_6, %c0_7] : memref<8x288xf32, #tpu.memory_space<vmem>>, vector<8x256xf32>
    %c0_8 = arith.constant 0 : index
    %c16_9 = arith.constant 16 : index
    %7 = vector.load %arg4[%c0_8, %c16_9] : memref<8x288xf32, #tpu.memory_space<vmem>>, vector<8x256xf32>
    %cst_10 = arith.constant 2.000000e+00 : f32
    %8 = vector.broadcast %cst_10 : f32 to vector<8x256xf32>
    %9 = arith.mulf %8, %7 : vector<8x256xf32>
    %10 = arith.addf %6, %9 : vector<8x256xf32>
    %c0_11 = arith.constant 0 : index
    %c32 = arith.constant 32 : index
    %11 = vector.load %arg4[%c0_11, %c32] : memref<8x288xf32, #tpu.memory_space<vmem>>, vector<8x256xf32>
    %12 = arith.addf %10, %11 : vector<8x256xf32>
    %cst_12 = arith.constant 0.000000e+00 : f32
    %13 = vector.broadcast %cst_12 : f32 to vector<8x1xf32>
    %c0_13 = arith.constant 0 : index
    %c0_14 = arith.constant 0 : index
    %14 = vector.load %arg5[%c0_13, %c0_14] : memref<8x258xf32, #tpu.memory_space<vmem>>, vector<8x1xf32>
    tpu.vector_store %arg5[%c0_13, %c0_14], %13 {strides = array<i32>} : memref<8x258xf32, #tpu.memory_space<vmem>>, vector<8x1xf32>,
    %cst_15 = arith.constant 0.000000e+00 : f32
    %15 = vector.broadcast %cst_15 : f32 to vector<8x1xf32>
    %c0_16 = arith.constant 0 : index
    %c257 = arith.constant 257 : index
    %16 = vector.load %arg5[%c0_16, %c257] : memref<8x258xf32, #tpu.memory_space<vmem>>, vector<8x1xf32>
    tpu.vector_store %arg5[%c0_16, %c257], %15 {strides = array<i32>} : memref<8x258xf32, #tpu.memory_space<vmem>>, vector<8x1xf32>,
    %c0_17 = arith.constant 0 : index
    %c1 = arith.constant 1 : index
    %17 = vector.load %arg5[%c0_17, %c1] : memref<8x258xf32, #tpu.memory_space<vmem>>, vector<8x256xf32>
    tpu.vector_store %arg5[%c0_17, %c1], %12 {strides = array<i32>} : memref<8x258xf32, #tpu.memory_space<vmem>>, vector<8x256xf32>,
    %c0_18 = arith.constant 0 : index
    %c0_19 = arith.constant 0 : index
    %18 = vector.load %arg1[%c0_18, %c0_19] : memref<2x256xf32, #tpu.memory_space<vmem>>, vector<1x256xf32>
    %c1_20 = arith.constant 1 : index
    %c0_21 = arith.constant 0 : index
    %19 = vector.load %arg1[%c1_20, %c0_21] : memref<2x256xf32, #tpu.memory_space<vmem>>, vector<1x256xf32>
    %c0_22 = arith.constant 0 : index
    %c0_23 = arith.constant 0 : index
    %20 = vector.load %arg5[%c0_22, %c0_23] : memref<8x258xf32, #tpu.memory_space<vmem>>, vector<8x256xf32>
    %21 = vector.broadcast %18 : vector<1x256xf32> to vector<8x256xf32>
    %22 = arith.mulf %21, %20 : vector<8x256xf32>
    %c0_24 = arith.constant 0 : index
    %c1_25 = arith.constant 1 : index
    %23 = vector.load %arg5[%c0_24, %c1_25] : memref<8x258xf32, #tpu.memory_space<vmem>>, vector<8x256xf32>
    %cst_26 = arith.constant 2.000000e+00 : f32
    %24 = vector.broadcast %cst_26 : f32 to vector<8x256xf32>
    %25 = arith.mulf %24, %23 : vector<8x256xf32>
    %26 = arith.addf %22, %25 : vector<8x256xf32>
    %c0_27 = arith.constant 0 : index
    %c2 = arith.constant 2 : index
    %27 = vector.load %arg5[%c0_27, %c2] : memref<8x258xf32, #tpu.memory_space<vmem>>, vector<8x256xf32>
    %28 = vector.broadcast %19 : vector<1x256xf32> to vector<8x256xf32>
    %29 = arith.mulf %28, %27 : vector<8x256xf32>
    %30 = arith.addf %26, %29 : vector<8x256xf32>
    %cst_28 = arith.constant 6.250000e-02 : f32
    %31 = vector.broadcast %cst_28 : f32 to vector<8x256xf32>
    %32 = arith.mulf %30, %31 : vector<8x256xf32>
    %c0_29 = arith.constant 0 : index
    %c0_30 = arith.constant 0 : index
    %33 = vector.load %arg3[%c0_29, %c0_30] : memref<8x256xf32, #tpu.memory_space<vmem>>, vector<8x256xf32>
    tpu.vector_store %arg3[%c0_29, %c0_30], %32 {strides = array<i32>} : memref<8x256xf32, #tpu.memory_space<vmem>>, vector<8x256xf32>,
    return
  }
  func.func @transform_0(%arg0: i32) -> (i32, i32) {
    %c0_i32 = arith.constant 0 : i32
    %c0_i32_0 = arith.constant 0 : i32
    %c0_i32_1 = arith.constant 0 : i32
    return %c0_i32, %c0_i32_0 : i32, i32
  }
  func.func @transform_1(%arg0: i32) -> (i32, i32) {
    %c0_i32 = arith.constant 0 : i32
    %c0_i32_0 = arith.constant 0 : i32
    return %arg0, %c0_i32 : i32, i32
  }
  func.func @transform_2(%arg0: i32) -> (i32, i32) {
    %c0_i32 = arith.constant 0 : i32
    %c0_i32_0 = arith.constant 0 : i32
    return %arg0, %c0_i32 : i32, i32
  }
}

</mosaic_0001>

<bundles_post_ra>
// kernel: tpu_custom_call.1
= control target key start
LH: loop header
LB: loop body
LE: loop exit
PB: predicated region body
PF: predicated region fallthrough
CT: control target
= control target key end

     0   :  { %7 = vsyncpa [#allocation5], 0  ;;  %s325_s0 = inlined_call_operand.hbm [shape: f32[2,256], index: 0, kind: input, shape index: {}]   ;;  %s326_s1 = inlined_call_operand.hbm [shape: f32[8,256], index: 1, kind: input, shape index: {}]   ;;  %s327_s2 = inlined_call_operand.hbm [shape: f32[8,256], index: 2, kind: output, shape index: {}]  }
   0x1   :  { %8 = vsyncpa [#allocation8], 0 }
   0x2   :  { %9 = vsyncpa [#allocation6], 0  ;;  %s15_s11 = sshll.u32 %s325_s0, 4  ;;  %s281_s12 = smov [#allocation4]   ;;  %s16_s11 = int_to_ptr.hbm [resolvable:$true] %s15_s11 }
   0x3   :  { %s17_s13 = sshll.u32 %s281_s12, 4  ;;  %s26_s16 = sshll.u32 %s326_s1, 4  ;;  %s18_s13 = int_to_ptr.vmem [resolvable:$true] %s17_s13  ;;  %s27_s16 = int_to_ptr.hbm [resolvable:$true] %s26_s16 }
   0x4   :  { %20 = dma.hbm_to_vmem [thread:$0]  %s16_s11, 64, %s18_s13, [#allocation5]  }
   0x5   :  { %s282_s17 = smov [#allocation7]  }
   0x6   :  { %s28_s18 = sshll.u32 %s282_s17, 4  ;;  %s29_s18 = int_to_ptr.vmem [resolvable:$true] %s28_s18 }
   0x7   :  { %31 = dma.hbm_to_vmem [thread:$0]  %s27_s16, 256, %s29_s18, [#allocation8]  }
   0x8   :  { %275 = dma.done.wait [#allocation5], 64  }
   0x9   :  { %276 = vsyncadd [#allocation5], 4294967232 }
   0xa   :  { %277 = dma.done.wait [#allocation8], 256  }
   0xb   :  { %278 = vsyncadd [#allocation8], 4294967040  ;;  %vm40_vm0 = vcmask 130048   ;;  %v283_v0 = vmov 0.0   ;;  %v44_v1 = vld [vmem:[#allocation7] sm:$0xff]  ;;  %s284_s0 = smov 16  }
   0xc   :  { %41 = vst.msk [vmem:[#allocation2] sm:$0xff] %vm40_vm0, %v283_v0  ;;  %48 = vrot.lane.b32.xlu0 %v44_v1, %s284_s0  ;;  %v45_v2 = vld [vmem:[#allocation7 + $0x8] sm:$0xff]  ;;  %vm42_vm1 = vcmask 261248   ;;  %vm56_vm2 = vcmask 1047680   ;;  %s285_s1 = smov 96   ;;  %s286_s19 = smov 112  }
   0xd   :  { %43 = vst.msk [vmem:[#allocation2 + $0x10] sm:$0xff] %vm42_vm1, %v283_v0  ;;  %vm98_vm3 = vcmask 7168   ;;  %vm75_vm4 = vcmask 916480   ;;  %vm91_vm5 = vcmask 785408   ;;  %s287_s20 = smov 1   ;;  %vm100_vm6 = vcmask 15368  }
   0xe   :  { %99 = vst.msk [vmem:[#allocation3] sm:$0xff] %vm98_vm3, %v283_v0  ;;  %vm112_vm7 = vcmask 1047560   ;;  %s288_s21 = smov 127   ;;  %s289_s22 = smov 126   ;;  %vm141_vm8 = vcmask 1039360   ;;  %vm162_vm9 = vcmask 1031168  }
   0xf   :  { %101 = vst.msk [vmem:[#allocation3 + $0x10] sm:$0xff] %vm100_vm6, %v283_v0  ;;  %v116_v35 = vld [vmem:[#allocation4] ss:$2 sm:$0x3]  ;;  %s290_s23 = smov [#allocation9]   ;;  %s182_s27 = sshll.u32 %s327_s2, 4  ;;  %s183_s27 = int_to_ptr.hbm [resolvable:$true] %s182_s27 }
  0x10   :  { %v118_v36 = vld [vmem:[#allocation4 + $0x1] ss:$2 sm:$0x3]  ;;  %v122_v37 = vperm.slane %v116_v35, 0  ;;  %v123_v49 = vperm.slane %v116_v35, 1  ;;  %s180_s24 = sshll.u32 %s290_s23, 4  ;;  %s181_s24 = int_to_ptr.vmem [resolvable:$true] %s180_s24 }
  0x11   :  { %v149_v38 = vperm.slane %v118_v36, 0  ;;  %v150_v50 = vperm.slane %v118_v36, 1 }
  0x14   :  { %50 = vrot.lane.b32.xlu0 %v45_v2, %s284_s0 }
  0x7e   :  { %v49_v3 = vpop.permute.xlu0 %48 }
  0x7f   :  { %57 = vst.msk [vmem:[#allocation2] sm:$0xff] %vm56_vm2, %v49_v3 }
  0x86   :  { %v51_v4 = vpop.permute.xlu0 %50  ;;  %v60_v5 = vld [vmem:[#allocation2] sm:$0xff] }
  0x87   :  { %v52_v6 = vsel %vm40_vm0, %v49_v3, %v51_v4  ;;  %59 = vst.msk [vmem:[#allocation2 + $0x10] sm:$0xff] %vm40_vm0, %v51_v4  ;;  %v63_v7 = vmul.f32 2.0, %v60_v5 }
  0x88   :  { %87 = vrot.lane.b32.xlu0 %v52_v6, %s285_s1  ;;  %v64_v10 = vmul.f32 2.0, %v52_v6 }
  0x89   :  { %69 = vrot.lane.b32.xlu1 %v63_v7, %s286_s19 }
  0x8e   :  { %v62_v8 = vld [vmem:[#allocation2 + $0x10] sm:$0xff] }
  0x8f   :  { %v65_v9 = vmul.f32 2.0, %v62_v8 }
  0x91   :  { %73 = vrot.lane.b32.xlu2 %v65_v9, %s286_s19  ;;  %71 = vrot.lane.b32.xlu1 %v64_v10, %s286_s19 }
  0x99   :  { %85 = vrot.lane.b32.xlu2 %v60_v5, %s285_s1  ;;  %89 = vrot.lane.b32.xlu1 %v62_v8, %s285_s1 }
  0xeb   :  { %v74_v11 = vpop.permute.xlu2 %73 }
  0xf3   :  { %v86_v16 = vpop.permute.xlu2 %85 }
  0xfa   :  { %v88_v13 = vpop.permute.xlu0 %87 }
  0xfb   :  { %v70_v12 = vpop.permute.xlu1 %69  ;;  %v92_v18 = vsel %vm91_vm5, %v86_v16, %v88_v13 }
 0x103   :  { %v72_v14 = vpop.permute.xlu1 %71 }
 0x104   :  { %v76_v15 = vsel %vm75_vm4, %v70_v12, %v72_v14  ;;  %v77_v20 = vsel %vm75_vm4, %v72_v14, %v74_v11 }
 0x105   :  { %v80_v17 = vadd.f32 %v76_v15, %v60_v5  ;;  %v81_v21 = vadd.f32 %v77_v20, %v52_v6 }
 0x107   :  { %v96_v19 = vadd.f32 %v92_v18, %v80_v17 }
 0x109   :  { %104 = vrot.lane.b32.xlu2 %v96_v19, %s287_s20 }
 0x10b   :  { %v90_v22 = vpop.permute.xlu1 %89 }
 0x10c   :  { %v93_v23 = vsel %vm91_vm5, %v88_v13, %v90_v22 }
 0x10d   :  { %v97_v24 = vadd.f32 %v93_v23, %v81_v21 }
 0x10f   :  { %106 = vrot.lane.b32.xlu0 %v97_v24, %s287_s20 }
 0x163   :  { %v105_v25 = vpop.permute.xlu2 %104 }
 0x164   :  { %113 = vst.msk [vmem:[#allocation3] sm:$0xff] %vm112_vm7, %v105_v25 }
 0x16b   :  { %v119_v26 = vld [vmem:[#allocation3] sm:$0xff] }
 0x16c   :  { %v129_v27 = vmul.f32 2.0, %v119_v26  ;;  %v126_v41 = vmul.f32 %v122_v37, %v119_v26 }
 0x16e   :  { %135 = vrot.lane.b32.xlu1 %v129_v27, %s288_s21 }
 0x176   :  { %156 = vrot.lane.b32.xlu1 %v119_v26, %s289_s22 }
 0x181   :  { %v107_v28 = vpop.permute.xlu0 %106 }
 0x182   :  { %v108_v29 = vsel %vm98_vm3, %v105_v25, %v107_v28  ;;  %115 = vst.msk [vmem:[#allocation3 + $0x10] sm:$0xff] %vm98_vm3, %v107_v28 }
 0x183   :  { %v130_v30 = vmul.f32 2.0, %v108_v29  ;;  %v127_v52 = vmul.f32 %v123_v49, %v108_v29 }
 0x185   :  { %137 = vrot.lane.b32.xlu2 %v130_v30, %s288_s21 }
 0x189   :  { %v128_v31 = vld [vmem:[#allocation3 + $0x10] sm:$0xff] }
 0x18a   :  { %v131_v32 = vmul.f32 2.0, %v128_v31 }
 0x18c   :  { %139 = vrot.lane.b32.xlu0 %v131_v32, %s288_s21 }
 0x18d   :  { %158 = vrot.lane.b32.xlu2 %v108_v29, %s289_s22 }
 0x194   :  { %160 = vrot.lane.b32.xlu0 %v128_v31, %s289_s22 }
 0x1df   :  { %v138_v33 = vpop.permute.xlu2 %137 }
 0x1e0   :  { %v136_v34 = vpop.permute.xlu1 %135 }
 0x1e1   :  { %v142_v39 = vsel %vm141_vm8, %v136_v34, %v138_v33 }
 0x1e2   :  { %v146_v44 = vadd.f32 %v142_v39, %v126_v41 }
 0x1e7   :  { %v159_v40 = vpop.permute.xlu2 %158 }
 0x1e8   :  { %v157_v42 = vpop.permute.xlu1 %156 }
 0x1e9   :  { %v163_v43 = vsel %vm162_vm9, %v157_v42, %v159_v40 }
 0x1ea   :  { %v167_v45 = vmul.f32 %v163_v43, %v149_v38 }
 0x1ec   :  { %v169_v46 = vadd.f32 %v167_v45, %v146_v44 }
 0x1ee   :  { %v171_v47 = vmul.f32 0.0625, %v169_v46 }
 0x1f0   :  { %173 = vst [vmem:[#allocation9] sm:$0xff] %v171_v47 }
 0x1fe   :  { %v140_v48 = vpop.permute.xlu0 %139 }
 0x1ff   :  { %v143_v51 = vsel %vm141_vm8, %v138_v33, %v140_v48 }
 0x200   :  { %v147_v55 = vadd.f32 %v143_v51, %v127_v52 }
 0x206   :  { %v161_v53 = vpop.permute.xlu0 %160 }
 0x207   :  { %v164_v54 = vsel %vm162_vm9, %v159_v40, %v161_v53 }
 0x208   :  { %v168_v56 = vmul.f32 %v164_v54, %v150_v50 }
 0x20a   :  { %v170_v57 = vadd.f32 %v168_v56, %v147_v55 }
 0x20c   :  { %v172_v58 = vmul.f32 0.0625, %v170_v57 }
 0x20e   :  { %174 = vst [vmem:[#allocation9 + $0x8] sm:$0xff] %v172_v58 }
 0x20f   :  { %185 = dma.vmem_to_hbm [thread:$0]  %s181_s24, 256, %s183_s27, [#allocation6]  }
 0x210   :  { %279 = dma.done.wait [#allocation6], 256  }
 0x211   :  { %280 = vsyncadd [#allocation6], 4294967040 }
 0x212   :  { %190 = vsyncpa [#allocation5], 1 }
 0x213   :  { %191 = vsyncpa [#allocation8], 1 }
 0x214   :  { %192 = vsyncpa [#allocation6], 1 }

</bundles_post_ra>
